<compile_context>
chip_gen: v6e
topology: v6e:2x2x1
jax: 0.10.0
libtpu: 0.0.40
codegen_flags: <defaults>
</compile_context>

<pallas_src>
import functools
import math

import jax
import jax.numpy as jnp
from jax.experimental import pallas as pl
from jax.experimental.pallas import tpu as pltpu


def _round_up(n, m):
    return ((n + m - 1) // m) * m


def _norm_softmax_kernel(x_ref, w_ref, invw_ref, tgt_ref, out_ref,
                         m_ref, l_ref, t_ref, *, alpha, c_total, tn):
    ci = pl.program_id(1)

    @pl.when(ci == 0)
    def _init():
        m_ref[...] = jnp.full(m_ref.shape, -jnp.inf, dtype=jnp.float32)
        l_ref[...] = jnp.zeros(l_ref.shape, dtype=jnp.float32)
        t_ref[...] = jnp.zeros(t_ref.shape, dtype=jnp.float32)

    x = x_ref[...]               # (TM, D) in the input dtype (bf16 stays bf16 into MXU)
    w = w_ref[...]               # (TN, D)
    inv_w = invw_ref[...]        # (1, TN) f32: 1 / max(||w_c||, eps)   (hoisted)
    tgt = tgt_ref[...]           # (TM, 1) int32

    # Row inverse norms of x in f32.  Matches F.normalize eps semantics:
    #   1 / max(||x||, 1e-12) == rsqrt(max(||x||^2, 1e-24)).
    xf = x.astype(jnp.float32)
    inv_x = jax.lax.rsqrt(
        jnp.maximum(jnp.sum(xf * xf, axis=1, keepdims=True), jnp.float32(1e-24)))

    # Raw similarity on the MXU: contract D of both operands (no transposed copy of w).
    s = jax.lax.dot_general(
        x, w, (((1,), (1,)), ((), ())), preferred_element_type=jnp.float32)   # (TM, TN)

    logits = s * (jnp.float32(alpha) * inv_x) * inv_w                         # (TM, TN)

    # Global class ids for this tile (used for the fused target gather and, when the
    # class dim is padded, for masking the padded columns out of the LSE).
    cls = ci * tn + jax.lax.broadcasted_iota(jnp.int32, logits.shape, 1)
    if c_total % tn != 0:
        logits = jnp.where(cls < c_total, logits, jnp.float32(-1e30))

    # Online log-sum-exp update.
    m_prev = m_ref[...]
    m_new = jnp.maximum(m_prev, jnp.max(logits, axis=1, keepdims=True))
    corr = jnp.exp(m_prev - m_new)
    l_ref[...] = corr * l_ref[...] + jnp.sum(jnp.exp(logits - m_new),
                                             axis=1, keepdims=True)
    m_ref[...] = m_new

    # Fused target-logit gather for the classes living in this tile.
    t_ref[...] = t_ref[...] + jnp.sum(
        jnp.where(cls == tgt, logits, jnp.float32(0.0)), axis=1, keepdims=True)

    @pl.when(ci == pl.num_programs(1) - 1)
    def _finalize():
        out_ref[...] = m_ref[...] + jnp.log(l_ref[...]) - t_ref[...]


def norm_softmax_loss(x, proxy, target, alpha=32.0):
    """x: (B, D) float, proxy: (C, D) float, target: (B,) int -> scalar f32 loss."""
    B, D = x.shape
    C, D2 = proxy.shape
    assert D == D2

    # Tile sizes: lane-dense / MXU-friendly (multiples of 8 and 128) with minimal padding
    # for small problems.  D is kept whole per block (fits VMEM for typical embed sizes).
    TM = min(256, _round_up(B, 8))
    TN = min(512, _round_up(C, 128))
    B_pad = _round_up(B, TM)
    C_pad = _round_up(C, TN)

    x_p = jnp.pad(x, ((0, B_pad - B), (0, 0))) if B_pad != B else x
    w_p = jnp.pad(proxy, ((0, C_pad - C), (0, 0))) if C_pad != C else proxy
    tgt = target.astype(jnp.int32).reshape(B, 1)
    tgt_p = jnp.pad(tgt, ((0, B_pad - B), (0, 0))) if B_pad != B else tgt

    # Per-class inverse norms, computed once (hoisted out of the batch-tile loop).
    pf = proxy.astype(jnp.float32)
    inv_w = jax.lax.rsqrt(
        jnp.maximum(jnp.sum(pf * pf, axis=1), jnp.float32(1e-24)))            # (C,)
    inv_w = jnp.pad(inv_w, (0, C_pad - C)).reshape(1, C_pad)

    grid = (B_pad // TM, C_pad // TN)
    kernel = functools.partial(_norm_softmax_kernel,
                               alpha=float(alpha), c_total=C, tn=TN)

    per_row = pl.pallas_call(
        kernel,
        out_shape=jax.ShapeDtypeStruct((B_pad, 1), jnp.float32),
        grid_spec=pltpu.PrefetchScalarGridSpec(
            num_scalar_prefetch=0,
            grid=grid,
            in_specs=[
                pl.BlockSpec((TM, D), lambda bi, ci: (bi, 0)),   # x tile (revisited over ci)
                pl.BlockSpec((TN, D), lambda bi, ci: (ci, 0)),   # proxy tile
                pl.BlockSpec((1, TN), lambda bi, ci: (0, ci)),   # 1 / ||w_c|| (lane-dense)
                pl.BlockSpec((TM, 1), lambda bi, ci: (bi, 0)),   # target ids
            ],
            out_specs=pl.BlockSpec((TM, 1), lambda bi, ci: (bi, 0)),
            scratch_shapes=[pltpu.VMEM((TM, 1), jnp.float32),    # running max m
                            pltpu.VMEM((TM, 1), jnp.float32),    # running exp-sum l
                            pltpu.VMEM((TM, 1), jnp.float32)],   # running target logit
        ),
        compiler_params=pltpu.CompilerParams(
            dimension_semantics=("parallel", "arbitrary")),
    )(x_p, w_p, inv_w, tgt_p)

    return jnp.mean(per_row[:B, 0])


def _reference(x, proxy, target, alpha=32.0):
    x = x.astype(jnp.float32)
    proxy = proxy.astype(jnp.float32)
    x_n = x / jnp.maximum(jnp.linalg.norm(x, axis=1, keepdims=True), 1e-12)
    w_n = proxy / jnp.maximum(jnp.linalg.norm(proxy, axis=1, keepdims=True), 1e-12)
    logits = alpha * (x_n @ w_n.T)
    lse = jax.scipy.special.logsumexp(logits, axis=1)
    tgt_logit = jnp.take_along_axis(
        logits, target[:, None].astype(jnp.int32), axis=1)[:, 0]
    return jnp.mean(lse - tgt_logit)


if __name__ == "__main__":
    key = jax.random.PRNGKey(0)
    alpha = 32.0
    # (B, D, C): one tile-aligned config and one exercising batch/class padding + masking.
    configs = [(8, 32, 16), (12, 48, 200)]
    for idx, (B, D, C) in enumerate(configs):
        kx, kp, kt = jax.random.split(jax.random.fold_in(key, idx), 3)
        # kaiming_uniform_(a=sqrt(5)) on (C, D): bound = 1/sqrt(fan_in) = 1/sqrt(D)
        bound = 1.0 / math.sqrt(D)
        proxy = jax.random.uniform(kp, (C, D), jnp.float32, minval=-bound, maxval=bound)
        x = jax.random.normal(kx, (B, D), jnp.float32)
        target = jax.random.randint(kt, (B,), 0, C, dtype=jnp.int32)

        loss = jax.block_until_ready(norm_softmax_loss(x, proxy, target, alpha=alpha))
        ref = jax.block_until_ready(_reference(x, proxy, target, alpha=alpha))
        assert jnp.allclose(loss, ref, atol=1e-4, rtol=1e-4), (B, D, C, loss, ref)

    print("KERNEL_OK")
</pallas_src>

<mosaic_0001>
module attributes {stable_mosaic.version = 11 : i64} {
  func.func @_norm_softmax_kernel(%arg0: i32, %arg1: i32, %arg2: memref<8x32xf32, #tpu.memory_space<vmem>>, %arg3: memref<128x32xf32, #tpu.memory_space<vmem>>, %arg4: memref<1x128xf32, #tpu.memory_space<vmem>>, %arg5: memref<8x1xi32, #tpu.memory_space<vmem>>, %arg6: memref<8x1xf32, #tpu.memory_space<vmem>>, %arg7: memref<8x1xf32, #tpu.memory_space<vmem>>, %arg8: memref<8x1xf32, #tpu.memory_space<vmem>>, %arg9: memref<8x1xf32, #tpu.memory_space<vmem>>) attributes {dimension_semantics = [#tpu.dimension_semantics<parallel>, #tpu.dimension_semantics<arbitrary>], iteration_bounds = array<i64: 1, 1>, scalar_prefetch = 0 : i64, scratch_operands = 3 : i64, tpu.core_type = #tpu.core_type<tc>, window_params = [{transform_indices = @transform_0, window_bounds = array<i64: 8, 32>}, {transform_indices = @transform_1, window_bounds = array<i64: 128, 32>}, {transform_indices = @transform_2, window_bounds = array<i64: 1, 128>}, {transform_indices = @transform_3, window_bounds = array<i64: 8, 1>}, {transform_indices = @transform_4, window_bounds = array<i64: 8, 1>}]} {
    %c0_i32 = arith.constant 0 : i32
    %0 = arith.cmpi eq, %arg1, %c0_i32 : i32
    %1 = arith.extui %0 : i1 to i32
    %c0_i32_0 = arith.constant 0 : i32
    %2 = arith.cmpi ne, %1, %c0_i32_0 : i32
    scf.if %2 {
      %cst_30 = arith.constant 0xFF800000 : f32
      %56 = vector.broadcast %cst_30 : f32 to vector<8x1xf32>
      %c0_31 = arith.constant 0 : index
      %c0_32 = arith.constant 0 : index
      %57 = vector.load %arg7[%c0_31, %c0_32] : memref<8x1xf32, #tpu.memory_space<vmem>>, vector<8x1xf32>
      tpu.vector_store %arg7[%c0_31, %c0_32], %56 {strides = array<i32>} : memref<8x1xf32, #tpu.memory_space<vmem>>, vector<8x1xf32>,
      %cst_33 = arith.constant 0.000000e+00 : f32
      %58 = vector.broadcast %cst_33 : f32 to vector<8x1xf32>
      %c0_34 = arith.constant 0 : index
      %c0_35 = arith.constant 0 : index
      %59 = vector.load %arg8[%c0_34, %c0_35] : memref<8x1xf32, #tpu.memory_space<vmem>>, vector<8x1xf32>
      tpu.vector_store %arg8[%c0_34, %c0_35], %58 {strides = array<i32>} : memref<8x1xf32, #tpu.memory_space<vmem>>, vector<8x1xf32>,
      %cst_36 = arith.constant 0.000000e+00 : f32
      %60 = vector.broadcast %cst_36 : f32 to vector<8x1xf32>
      %c0_37 = arith.constant 0 : index
      %c0_38 = arith.constant 0 : index
      %61 = vector.load %arg9[%c0_37, %c0_38] : memref<8x1xf32, #tpu.memory_space<vmem>>, vector<8x1xf32>
      tpu.vector_store %arg9[%c0_37, %c0_38], %60 {strides = array<i32>} : memref<8x1xf32, #tpu.memory_space<vmem>>, vector<8x1xf32>,
    } else {
    }
    %c0 = arith.constant 0 : index
    %c0_1 = arith.constant 0 : index
    %3 = vector.load %arg2[%c0, %c0_1] : memref<8x32xf32, #tpu.memory_space<vmem>>, vector<8x32xf32>
    %c0_2 = arith.constant 0 : index
    %c0_3 = arith.constant 0 : index
    %4 = vector.load %arg3[%c0_2, %c0_3] : memref<128x32xf32, #tpu.memory_space<vmem>>, vector<128x32xf32>
    %c0_4 = arith.constant 0 : index
    %c0_5 = arith.constant 0 : index
    %5 = vector.load %arg4[%c0_4, %c0_5] : memref<1x128xf32, #tpu.memory_space<vmem>>, vector<1x128xf32>
    %c0_6 = arith.constant 0 : index
    %c0_7 = arith.constant 0 : index
    %6 = vector.load %arg5[%c0_6, %c0_7] : memref<8x1xi32, #tpu.memory_space<vmem>>, vector<8x1xi32>
    %7 = arith.mulf %3, %3 : vector<8x32xf32>
    %cst = arith.constant dense<0.000000e+00> : vector<8xf32>
    %8 = vector.multi_reduction <add>, %7, %cst [1] : vector<8x32xf32> to vector<8xf32>
    %9 = vector.shape_cast %8 : vector<8xf32> to vector<8x1xf32>
    %cst_8 = arith.constant 1.000000e-24 : f32
    %10 = vector.broadcast %cst_8 : f32 to vector<8x1xf32>
    %11 = arith.maximumf %9, %10 : vector<8x1xf32>
    %12 = math.rsqrt %11 : vector<8x1xf32>
    %cst_9 = arith.constant dense<0.000000e+00> : vector<8x128xf32>
    %13 = tpu.matmul %3, %4, %cst_9 {dimension_numbers = #tpu.dot_dimension_numbers<[1], [1], [0], [0], [0, 0, 1, 0], [], []>} : vector<8x32xf32>, vector<128x32xf32>, vector<8x128xf32> -> vector<8x128xf32>
    %cst_10 = arith.constant 3.200000e+01 : f32
    %14 = vector.broadcast %cst_10 : f32 to vector<8x1xf32>
    %15 = arith.mulf %14, %12 : vector<8x1xf32>
    %16 = vector.broadcast %15 : vector<8x1xf32> to vector<8x128xf32>
    %17 = arith.mulf %13, %16 : vector<8x128xf32>
    %18 = vector.broadcast %5 : vector<1x128xf32> to vector<8x128xf32>
    %19 = arith.mulf %17, %18 : vector<8x128xf32>
    %c128_i32 = arith.constant 128 : i32
    %20 = arith.muli %arg1, %c128_i32 : i32
    %21 = tpu.iota {dimensions = array<i32: 1>} : vector<8x128xi32>
    %22 = vector.broadcast %20 : i32 to vector<8x128xi32>
    %23 = arith.addi %22, %21 : vector<8x128xi32>
    %c16_i32 = arith.constant 16 : i32
    %24 = vector.broadcast %c16_i32 : i32 to vector<8x128xi32>
    %25 = arith.cmpi slt, %23, %24 : vector<8x128xi32>
    %cst_11 = arith.constant -1.000000e+30 : f32
    %26 = vector.broadcast %cst_11 : f32 to vector<8x128xf32>
    %27 = arith.select %25, %19, %26 : vector<8x128xi1>, vector<8x128xf32>
    %c0_12 = arith.constant 0 : index
    %c0_13 = arith.constant 0 : index
    %28 = vector.load %arg7[%c0_12, %c0_13] : memref<8x1xf32, #tpu.memory_space<vmem>>, vector<8x1xf32>
    %cst_14 = arith.constant dense<0xFF800000> : vector<8xf32>
    %29 = vector.multi_reduction <maximumf>, %27, %cst_14 [1] : vector<8x128xf32> to vector<8xf32>
    %30 = vector.shape_cast %29 : vector<8xf32> to vector<8x1xf32>
    %31 = arith.maximumf %28, %30 : vector<8x1xf32>
    %32 = arith.subf %28, %31 : vector<8x1xf32>
    %33 = math.exp %32 : vector<8x1xf32>
    %c0_15 = arith.constant 0 : index
    %c0_16 = arith.constant 0 : index
    %34 = vector.load %arg8[%c0_15, %c0_16] : memref<8x1xf32, #tpu.memory_space<vmem>>, vector<8x1xf32>
    %35 = arith.mulf %33, %34 : vector<8x1xf32>
    %36 = vector.broadcast %31 : vector<8x1xf32> to vector<8x128xf32>
    %37 = arith.subf %27, %36 : vector<8x128xf32>
    %38 = math.exp %37 : vector<8x128xf32>
    %cst_17 = arith.constant dense<0.000000e+00> : vector<8xf32>
    %39 = vector.multi_reduction <add>, %38, %cst_17 [1] : vector<8x128xf32> to vector<8xf32>
    %40 = vector.shape_cast %39 : vector<8xf32> to vector<8x1xf32>
    %41 = arith.addf %35, %40 : vector<8x1xf32>
    %c0_18 = arith.constant 0 : index
    %c0_19 = arith.constant 0 : index
    %42 = vector.load %arg8[%c0_18, %c0_19] : memref<8x1xf32, #tpu.memory_space<vmem>>, vector<8x1xf32>
    tpu.vector_store %arg8[%c0_18, %c0_19], %41 {strides = array<i32>} : memref<8x1xf32, #tpu.memory_space<vmem>>, vector<8x1xf32>,
    %c0_20 = arith.constant 0 : index
    %c0_21 = arith.constant 0 : index
    %43 = vector.load %arg7[%c0_20, %c0_21] : memref<8x1xf32, #tpu.memory_space<vmem>>, vector<8x1xf32>
    tpu.vector_store %arg7[%c0_20, %c0_21], %31 {strides = array<i32>} : memref<8x1xf32, #tpu.memory_space<vmem>>, vector<8x1xf32>,
    %c0_22 = arith.constant 0 : index
    %c0_23 = arith.constant 0 : index
    %44 = vector.load %arg9[%c0_22, %c0_23] : memref<8x1xf32, #tpu.memory_space<vmem>>, vector<8x1xf32>
    %45 = vector.broadcast %6 : vector<8x1xi32> to vector<8x128xi32>
    %46 = arith.cmpi eq, %23, %45 : vector<8x128xi32>
    %cst_24 = arith.constant 0.000000e+00 : f32
    %47 = vector.broadcast %cst_24 : f32 to vector<8x128xf32>
    %48 = arith.select %46, %27, %47 : vector<8x128xi1>, vector<8x128xf32>
    %cst_25 = arith.constant dense<0.000000e+00> : vector<8xf32>
    %49 = vector.multi_reduction <add>, %48, %cst_25 [1] : vector<8x128xf32> to vector<8xf32>
    %50 = vector.shape_cast %49 : vector<8xf32> to vector<8x1xf32>
    %51 = arith.addf %44, %50 : vector<8x1xf32>
    %c0_26 = arith.constant 0 : index
    %c0_27 = arith.constant 0 : index
    %52 = vector.load %arg9[%c0_26, %c0_27] : memref<8x1xf32, #tpu.memory_space<vmem>>, vector<8x1xf32>
    tpu.vector_store %arg9[%c0_26, %c0_27], %51 {strides = array<i32>} : memref<8x1xf32, #tpu.memory_space<vmem>>, vector<8x1xf32>,
    %c0_i32_28 = arith.constant 0 : i32
    %53 = arith.cmpi eq, %arg1, %c0_i32_28 : i32
    %54 = arith.extui %53 : i1 to i32
    %c0_i32_29 = arith.constant 0 : i32
    %55 = arith.cmpi ne, %54, %c0_i32_29 : i32
    scf.if %55 {
      %c0_30 = arith.constant 0 : index
      %c0_31 = arith.constant 0 : index
      %56 = vector.load %arg7[%c0_30, %c0_31] : memref<8x1xf32, #tpu.memory_space<vmem>>, vector<8x1xf32>
      %c0_32 = arith.constant 0 : index
      %c0_33 = arith.constant 0 : index
      %57 = vector.load %arg8[%c0_32, %c0_33] : memref<8x1xf32, #tpu.memory_space<vmem>>, vector<8x1xf32>
      %58 = math.log %57 : vector<8x1xf32>
      %59 = arith.addf %56, %58 : vector<8x1xf32>
      %c0_34 = arith.constant 0 : index
      %c0_35 = arith.constant 0 : index
      %60 = vector.load %arg9[%c0_34, %c0_35] : memref<8x1xf32, #tpu.memory_space<vmem>>, vector<8x1xf32>
      %61 = arith.subf %59, %60 : vector<8x1xf32>
      %c0_36 = arith.constant 0 : index
      %c0_37 = arith.constant 0 : index
      %62 = vector.load %arg6[%c0_36, %c0_37] : memref<8x1xf32, #tpu.memory_space<vmem>>, vector<8x1xf32>
      tpu.vector_store %arg6[%c0_36, %c0_37], %61 {strides = array<i32>} : memref<8x1xf32, #tpu.memory_space<vmem>>, vector<8x1xf32>,
    } else {
    }
    return
  }
  func.func @transform_0(%arg0: i32, %arg1: i32) -> (i32, i32) {
    %c0_i32 = arith.constant 0 : i32
    %c0_i32_0 = arith.constant 0 : i32
    return %arg0, %c0_i32 : i32, i32
  }
  func.func @transform_1(%arg0: i32, %arg1: i32) -> (i32, i32) {
    %c0_i32 = arith.constant 0 : i32
    %c0_i32_0 = arith.constant 0 : i32
    return %arg1, %c0_i32 : i32, i32
  }
  func.func @transform_2(%arg0: i32, %arg1: i32) -> (i32, i32) {
    %c0_i32 = arith.constant 0 : i32
    %c0_i32_0 = arith.constant 0 : i32
    return %c0_i32, %arg1 : i32, i32
  }
  func.func @transform_3(%arg0: i32, %arg1: i32) -> (i32, i32) {
    %c0_i32 = arith.constant 0 : i32
    %c0_i32_0 = arith.constant 0 : i32
    return %arg0, %c0_i32 : i32, i32
  }
  func.func @transform_4(%arg0: i32, %arg1: i32) -> (i32, i32) {
    %c0_i32 = arith.constant 0 : i32
    %c0_i32_0 = arith.constant 0 : i32
    return %arg0, %c0_i32 : i32, i32
  }
}

</mosaic_0001>

<bundles_post_ra>
// kernel: tpu_custom_call.1
= control target key start
LH: loop header
LB: loop body
LE: loop exit
PB: predicated region body
PF: predicated region fallthrough
CT: control target
= control target key end

     0   :  { %vm45_vm0 = vcmask 261120   ;;  %v320_v0 = vmov 0.0   ;;  %vm321_vm1 = vmmov 0   ;;  %vm21_vm2 = vcmask 7168   ;;  %s434_s1 = inlined_call_operand.vmem [shape: f32[128,32], index: 1, kind: input, shape index: {}]   ;;  %s435_s0 = inlined_call_operand.vmem [shape: f32[8,32], index: 0, kind: input, shape index: {}]   ;;  %s436_s2 = inlined_call_operand.vmem [shape: f32[1,128], index: 2, kind: input, shape index: {}]   ;;  %s437_s3 = inlined_call_operand.vmem [shape: s32[8,1], index: 3, kind: input, shape index: {}]   ;;  %s438_s4 = inlined_call_operand.vmem [shape: f32[8,1], index: 4, kind: output, shape index: {}]  }
   0x1   :  { %271 = vmatprep.subr.mxu0 %v320_v0  ;;  %v41_v1 = vld [vmem:[%s434_s1 + $0x78] sm:$0xff]  ;;  %303 = vmatprep.mubr.msk.f32.mxu0 %vm321_vm1, %v320_v0  ;;  %v40_v2 = vld [vmem:[%s434_s1 + $0x70] sm:$0xff]  ;;  %v25_v3 = vld [vmem:[%s435_s0] sm:$0xff]  ;;  %v322_v20 = vmov -inf   ;;  %23 = vst.msk [vmem:[#allocation3] sm:$0xff] %vm21_vm2, %v320_v0  ;;  %v182_v24 = vlaneseq  ;;  %v323_v33 = vmov 0  }
   0x2   :  { %272 = vmatpush3.xpose.msk.msra.mxu0 %vm45_vm0, %v41_v1  ;;  %v39_v4 = vld [vmem:[%s434_s1 + $0x68] sm:$0xff]  ;;  %v44_v5 = vmul.f32 %v25_v3, %v25_v3  ;;  %v38_v7 = vld [vmem:[%s434_s1 + $0x60] sm:$0xff]  ;;  %v37_v8 = vld [vmem:[%s434_s1 + $0x58] sm:$0xff]  ;;  %22 = vst.msk [vmem:[#allocation2] sm:$0xff] %vm21_vm2, %v322_v20  ;;  %310 = vset.pattern.permute.xlu1 %v323_v33 }
   0x3   :  { %273 = vmatprep.subr.mxu0 %v320_v0  ;;  %v36_v9 = vld [vmem:[%s434_s1 + $0x50] sm:$0xff]  ;;  %v35_v10 = vld [vmem:[%s434_s1 + $0x48] sm:$0xff]  ;;  %v34_v11 = vld [vmem:[%s434_s1 + $0x40] sm:$0xff]  ;;  %24 = vst.msk [vmem:[#allocation4] sm:$0xff] %vm21_vm2, %v320_v0  ;;  %v183_v26 = vand.u32 127, %v182_v24  ;;  %311 = vset.pattern.permute.xlu0 %v323_v33 }
   0x4   :  { %v46_v6 = vsel %vm45_vm0, %v44_v5, 0.0  ;;  %v33_v12 = vld [vmem:[%s434_s1 + $0x38] sm:$0xff]  ;;  %v32_v13 = vld [vmem:[%s434_s1 + $0x30] sm:$0xff]  ;;  %v31_v14 = vld [vmem:[%s434_s1 + $0x28] sm:$0xff] }
   0x5   :  { %47 = vadd.xlane.f32.xlu0 %v46_v6  ;;  %v30_v15 = vld [vmem:[%s434_s1 + $0x20] sm:$0xff]  ;;  %v29_v16 = vld [vmem:[%s434_s1 + $0x18] sm:$0xff]  ;;  %v28_v17 = vld [vmem:[%s434_s1 + $0x10] sm:$0xff]  ;;  %vm186_vm3 = vcmp.lt.s32.totalorder %v183_v26, 16 }
   0x6   :  { %274 = vmatpush3.xpose.msk.msra.mxu0 %vm45_vm0, %v40_v2  ;;  %v27_v18 = vld [vmem:[%s434_s1 + $0x8] sm:$0xff]  ;;  %v26_v19 = vld [vmem:[%s434_s1] sm:$0xff] }
   0x7   :  { %275 = vmatprep.subr.mxu0 %v320_v0  ;;  %v253_v27 = vld [vmem:[%s436_s2] ss:$0 sm:$0xff] }
   0x8   :  { %v43_v38 = vld [vmem:[%s437_s3] sm:$0xff]  ;;  %v195_v50 = vld [vmem:[#allocation3] sm:$0xff] }
   0x9   :  { %v188_v34 = vld [vmem:[#allocation2] sm:$0xff] }
   0xa   :  { %276 = vmatpush3.xpose.msk.msra.mxu0 %vm45_vm0, %v39_v4  ;;  %v211_v46 = vld [vmem:[#allocation4] sm:$0xff] }
   0xb   :  { %277 = vmatprep.subr.mxu0 %v320_v0 }
   0xe   :  { %278 = vmatpush3.xpose.msk.msra.mxu0 %vm45_vm0, %v38_v7 }
   0xf   :  { %279 = vmatprep.subr.mxu0 %v320_v0 }
  0x12   :  { %280 = vmatpush3.xpose.msk.msra.mxu0 %vm45_vm0, %v37_v8 }
  0x13   :  { %281 = vmatprep.subr.mxu0 %v320_v0 }
  0x16   :  { %282 = vmatpush3.xpose.msk.msra.mxu0 %vm45_vm0, %v36_v9 }
  0x17   :  { %283 = vmatprep.subr.mxu0 %v320_v0 }
  0x1a   :  { %284 = vmatpush3.xpose.msk.msra.mxu0 %vm45_vm0, %v35_v10 }
  0x1b   :  { %285 = vmatprep.subr.mxu0 %v320_v0 }
  0x1e   :  { %286 = vmatpush3.xpose.msk.msra.mxu0 %vm45_vm0, %v34_v11 }
  0x1f   :  { %287 = vmatprep.subr.mxu0 %v320_v0 }
  0x22   :  { %288 = vmatpush3.xpose.msk.msra.mxu0 %vm45_vm0, %v33_v12 }
  0x23   :  { %289 = vmatprep.subr.mxu0 %v320_v0 }
  0x26   :  { %290 = vmatpush3.xpose.msk.msra.mxu0 %vm45_vm0, %v32_v13 }
  0x27   :  { %291 = vmatprep.subr.mxu0 %v320_v0 }
  0x2a   :  { %292 = vmatpush3.xpose.msk.msra.mxu0 %vm45_vm0, %v31_v14 }
  0x2b   :  { %293 = vmatprep.subr.mxu0 %v320_v0 }
  0x2e   :  { %294 = vmatpush3.xpose.msk.msra.mxu0 %vm45_vm0, %v30_v15 }
  0x2f   :  { %295 = vmatprep.subr.mxu0 %v320_v0 }
  0x32   :  { %296 = vmatpush3.xpose.msk.msra.mxu0 %vm45_vm0, %v29_v16 }
  0x33   :  { %297 = vmatprep.subr.mxu0 %v320_v0 }
  0x36   :  { %298 = vmatpush3.xpose.msk.msra.mxu0 %vm45_vm0, %v28_v17 }
  0x37   :  { %299 = vmatprep.subr.mxu0 %v320_v0 }
  0x3a   :  { %300 = vmatpush3.xpose.msk.msra.mxu0 %vm45_vm0, %v27_v18 }
  0x3b   :  { %301 = vmatprep.subr.mxu0 %v320_v0 }
  0x3e   :  { %302 = vmatpush3.xpose.msk.msra.mxu0 %vm45_vm0, %v26_v19 }
  0x41   :  { %304 = vmatmul.mubr.msk.f32.vlgmr.msra.gmra.mxu0 %vm45_vm0, %v25_v3 }
  0x8e   :  { %v48_v21 = vpop.xlane.xlu0 %47 }
  0x8f   :  { %v49_v22 = vmax.f32 %v48_v21, 1e-24 }
  0x91   :  { %312 = vrsqrt.f32 %v49_v22 }
  0x9e   :  { %v313_v23 = vpop.eup %312 }
  0x9f   :  { %v172_v25 = vmul.f32 32.0, %v313_v23 }
 0x101   :  { %v168_v28 = vpop.f32.mrf.mxu0 }
 0x102   :  { %v173_v29 = vmul.f32 %v172_v25, %v168_v28 }
 0x103   :  { %v305_v30 = vpop.f32.mrf.mxu0 }
 0x104   :  { %v180_v31 = vmul.f32 %v253_v27, %v173_v29 }
 0x106   :  { %v187_v32 = vsel %vm186_vm3, %v180_v31, -1e+30 }
 0x107   :  { %189 = vmax.xlane.f32.xlu0 %v187_v32 }
 0x190   :  { %v190_v35 = vpop.xlane.xlu0 %189 }
 0x191   :  { %v191_v36 = vmax.f32 %v188_v34, %v190_v35 }
 0x193   :  { %v192_v37 = vsub.f32 %v188_v34, %v191_v36  ;;  %210 = vst.msk [vmem:[#allocation2] sm:$0xff] %vm21_vm2, %v191_v36  ;;  %199 = vperm.xlu1 %310, %v191_v36  }
 0x195   :  { %v193_v45 = vmul.f32 1.442695, %v192_v37 }
 0x197   :  { %213 = vperm.xlu1 %310, %v43_v38  }
 0x19a   :  { %v224_v57 = vld [vmem:[#allocation2] sm:$0xff] }
 0x20e   :  { %v200_v39 = vpop.permute.xlu1 %199 }
 0x20f   :  { %v202_v40 = vsub.f32 %v187_v32, %v200_v39 }
 0x211   :  { %v203_v41 = vmul.f32 1.442695, %v202_v40 }
 0x212   :  { %v214_v42 = vpop.permute.xlu1 %213 }
 0x213   :  { %314 = vpow2.f32 %v203_v41  ;;  %vm215_vm4 = vcmp.eq.s32.totalorder %v183_v26, %v214_v42 }
 0x214   :  { %v216_v43 = vsel %vm215_vm4, %v187_v32, 0.0  ;;  %316 = vpow2.f32 %v193_v45 }
 0x215   :  { %217 = vadd.xlane.f32.xlu1 %v216_v43 }
 0x220   :  { %v315_v44 = vpop.eup %314 }
 0x221   :  { %205 = vadd.xlane.f32.xlu0 %v315_v44  ;;  %v317_v49 = vpop.eup %316 }
 0x222   :  { %v196_v51 = vmul.f32 %v317_v49, %v195_v50 }
 0x29e   :  { %v218_v47 = vpop.xlane.xlu1 %217 }
 0x29f   :  { %v219_v48 = vadd.f32 %v218_v47, %v211_v46 }
 0x2a1   :  { %220 = vst.msk [vmem:[#allocation4] sm:$0xff] %vm21_vm2, %v219_v48 }
 0x2a8   :  { %v229_v59 = vld [vmem:[#allocation4] sm:$0xff] }
 0x2aa   :  { %v206_v52 = vpop.xlane.xlu0 %205 }
 0x2ab   :  { %v207_v53 = vadd.f32 %v206_v52, %v196_v51 }
 0x2ad   :  { %209 = vst.msk [vmem:[#allocation3] sm:$0xff] %vm21_vm2, %v207_v53 }
 0x2b4   :  { %v225_v54 = vld [vmem:[#allocation3] sm:$0xff] }
 0x2b5   :  { %318 = vlog2.f32 %v225_v54 }
 0x2c2   :  { %v319_v55 = vpop.eup %318 }
 0x2c3   :  { %v227_v56 = vmul.f32 0.6931472, %v319_v55 }
 0x2c5   :  { %v228_v58 = vadd.f32 %v227_v56, %v224_v57 }
 0x2c7   :  { %v230_v60 = vsub.f32 %v228_v58, %v229_v59 }
 0x2c9   :  { %231 = vst.msk [vmem:[%s438_s4] sm:$0xff] %vm21_vm2, %v230_v60 }

</bundles_post_ra>
